<compile_context>
chip_gen: v7x
topology: tpu7x:2x2x1
jax: 0.10.0
libtpu: 0.0.40
codegen_flags: <defaults>
</compile_context>

<pallas_src>
import functools
import math

import jax
import jax.numpy as jnp
from jax.experimental import pallas as pl
from jax.experimental.pallas import tpu as pltpu

_MASK_VALUE = -1e30   # finite "-inf" (avoids -inf - -inf NaNs)


def _round_up(x, m):
    return -(-int(x) // m) * m


def _pick_tile(n, itemsize):
    """Largest preferred tile dividing n; dtype-aware (bigger tiles for bf16)."""
    candidates = (512, 256, 128) if itemsize <= 2 else (256, 128)
    for c in candidates:
        if n % c == 0:
            return c
    return n


def _qkv_vmem_limit(tm, d_model, in_size):
    tiles = 2 * in_size * (tm * d_model + 3 * tm * d_model)          # x + q/k/v tiles (2-buf)
    weights = 2 * (in_size * d_model * 3 * d_model + 4 * 3 * d_model)
    need = (tiles + weights + (2 << 20)) * 5 // 4
    return int(max(32 << 20, min(_round_up(need, 1 << 20), 64 << 20)))


def _attn_vmem_limit(tq, tk, d_model, n_heads, head_dim, in_size, out_size):
    tiles = 2 * in_size * (tq * d_model + 2 * tk * d_model)          # q + k + v tiles (2-buf)
    weights = 2 * (in_size * d_model * d_model + 4 * d_model)        # Wo + bo
    out = 2 * out_size * tq * d_model
    scratch = 4 * (2 * n_heads * tq + n_heads * tq * head_dim) + in_size * tq * d_model
    temps = 4 * tq * tk * 4 + (2 << 20)                              # f32 score/prob temps
    need = (tiles + weights + out + scratch + temps) * 5 // 4
    return int(max(32 << 20, min(_round_up(need, 1 << 20), 64 << 20)))


# --------------------------------------------------------------------------
# Kernel 1: fused QKV projection  (x @ [Wq*scale | Wk | Wv] + [bq*scale | bk | bv])
# --------------------------------------------------------------------------
def _qkv_proj_kernel(x_ref, w_ref, b_ref, q_ref, k_ref, v_ref, *, d_model):
    x = x_ref[0]                                                  # (TM, D) compute dtype
    qkv = jnp.dot(x, w_ref[...], preferred_element_type=jnp.float32)
    qkv = qkv + b_ref[0]                                          # bias in f32
    q_ref[0] = qkv[:, :d_model].astype(q_ref.dtype)
    k_ref[0] = qkv[:, d_model:2 * d_model].astype(k_ref.dtype)
    v_ref[0] = qkv[:, 2 * d_model:].astype(v_ref.dtype)


def _qkv_projection(x, w_qkv, b_qkv, *, row_tile=None):
    B, S, D = x.shape
    D3 = w_qkv.shape[1]
    itemsize = jnp.dtype(x.dtype).itemsize
    tm = row_tile or _pick_tile(S, itemsize)
    assert S % tm == 0

    flops = 2 * B * S * D * D3
    bytes_accessed = int(itemsize * (4 * B * S * D + D * D3) + 4 * D3)

    out_sds = jax.ShapeDtypeStruct((B, S, D), x.dtype)
    kernel = functools.partial(_qkv_proj_kernel, d_model=D)

    return pl.pallas_call(
        kernel,
        out_shape=(out_sds, out_sds, out_sds),
        grid_spec=pltpu.PrefetchScalarGridSpec(
            num_scalar_prefetch=0,
            grid=(B, S // tm),
            in_specs=[
                pl.BlockSpec((1, tm, D), lambda b, i: (b, i, 0)),   # x tile
                pl.BlockSpec((D, D3), lambda b, i: (0, 0)),          # fused W (const)
                pl.BlockSpec((1, D3), lambda b, i: (0, 0)),          # fused bias (const)
            ],
            out_specs=(
                pl.BlockSpec((1, tm, D), lambda b, i: (b, i, 0)),
                pl.BlockSpec((1, tm, D), lambda b, i: (b, i, 0)),
                pl.BlockSpec((1, tm, D), lambda b, i: (b, i, 0)),
            ),
        ),
        compiler_params=pltpu.CompilerParams(
            dimension_semantics=("parallel", "parallel"),
            vmem_limit_bytes=_qkv_vmem_limit(tm, D, itemsize)),
        cost_estimate=pl.CostEstimate(
            flops=flops, transcendentals=0, bytes_accessed=bytes_accessed),
    )(x, w_qkv, b_qkv)


# --------------------------------------------------------------------------
# Kernel 2: flash-style causal attention + fused output projection
# --------------------------------------------------------------------------
def _flash_attn_kernel(q_ref, k_ref, v_ref, wo_ref, bo_ref, o_ref,
                       m_ref, l_ref, acc_ref, ctx_ref, *,
                       n_heads, head_dim, q_tile, kv_tile):
    qi = pl.program_id(1)
    ki = pl.program_id(2)
    n_kv = pl.num_programs(2)

    @pl.when(ki == 0)
    def _init():
        m_ref[...] = jnp.full(m_ref.shape, -jnp.inf, m_ref.dtype)
        l_ref[...] = jnp.zeros(l_ref.shape, l_ref.dtype)
        acc_ref[...] = jnp.zeros(acc_ref.shape, acc_ref.dtype)

    q_start = qi * q_tile
    kv_start = ki * kv_tile
    needed = kv_start <= q_start + q_tile - 1        # tile has >= 1 unmasked column
    on_diag = kv_start + kv_tile - 1 > q_start       # tile straddles the diagonal

    def _attend(apply_mask):
        q = q_ref[0]                                  # (TQ, D)   compute dtype
        k = k_ref[0]                                  # (TKV, D)
        v = v_ref[0]                                  # (TKV, D)
        if apply_mask:
            row = q_start + jax.lax.broadcasted_iota(jnp.int32, (q_tile, kv_tile), 0)
            col = kv_start + jax.lax.broadcasted_iota(jnp.int32, (q_tile, kv_tile), 1)
            above = col > row
        for h in range(n_heads):                      # static unroll; heads stay in lanes
            sl = slice(h * head_dim, (h + 1) * head_dim)
            # scale already folded into Wq/bq at prep time
            s = jax.lax.dot_general(q[:, sl], k[:, sl], (((1,), (1,)), ((), ())),
                                    preferred_element_type=jnp.float32)   # (TQ, TKV)
            if apply_mask:
                s = jnp.where(above, _MASK_VALUE, s)
            m_prev = m_ref[h]                         # (TQ, 1)
            m_new = jnp.maximum(m_prev, jnp.max(s, axis=-1, keepdims=True))
            alpha = jnp.exp(m_prev - m_new)
            p = jnp.exp(s - m_new)
            l_ref[h] = alpha * l_ref[h] + jnp.sum(p, axis=-1, keepdims=True)
            acc_ref[h] = alpha * acc_ref[h] + jnp.dot(
                p.astype(v.dtype), v[:, sl], preferred_element_type=jnp.float32)
            m_ref[h] = m_new

    # Diagonal tiles need masking; interior tiles skip the iotas + select.
    @pl.when(jnp.logical_and(needed, on_diag))
    def _masked():
        _attend(True)

    @pl.when(jnp.logical_and(needed, jnp.logical_not(on_diag)))
    def _unmasked():
        _attend(False)

    @pl.when(ki == n_kv - 1)
    def _finalize():
        # Normalize per head into one lane-contiguous (TQ, D) context, then a
        # single full-K output-projection matmul against Wo.
        for h in range(n_heads):
            inv_l = pl.reciprocal(l_ref[h], approx=True)           # EUP slot
            ctx_ref[:, h * head_dim:(h + 1) * head_dim] = (
                acc_ref[h] * inv_l).astype(ctx_ref.dtype)
        out = jnp.dot(ctx_ref[...], wo_ref[...],
                      preferred_element_type=jnp.float32) + bo_ref[0]
        # TODO(synk): nn.Dropout(0.2) on attention weights is identity in eval
        # mode; training-mode dropout (pltpu.prng_random_bits) not implemented.
        o_ref[0] = out.astype(o_ref.dtype)


def _flash_causal_attention(q, k, v, wo, bo, *, n_heads, head_dim,
                            q_tile=None, kv_tile=None, out_dtype=None):
    B, S, D = q.shape
    itemsize = jnp.dtype(q.dtype).itemsize
    out_dtype = out_dtype or q.dtype
    out_itemsize = jnp.dtype(out_dtype).itemsize

    tq = q_tile or _pick_tile(S, itemsize)
    tk = kv_tile or _pick_tile(S, itemsize)
    if q_tile is None:
        # Keep both v7x TensorCores busy: at least 2 programs on parallel axes.
        while B * (S // tq) < 2 and tq > 128 and S % (tq // 2) == 0:
            tq //= 2
    assert S % tq == 0 and S % tk == 0

    n_q = S // tq
    kv_reread = (n_q + 1) / 2.0     # causal: each K/V tile read ~ (n_q+1)/2 times
    flops = int(2 * B * S * S * D + 2 * B * S * D * D)
    transcendentals = int(B * n_heads * S * S // 2)
    bytes_accessed = int(itemsize * B * S * D * (1 + 2 * kv_reread)
                         + itemsize * D * D + out_itemsize * B * S * D + 4 * D)

    kernel = functools.partial(
        _flash_attn_kernel, n_heads=n_heads, head_dim=head_dim,
        q_tile=tq, kv_tile=tk)

    def kv_map(b, qi, ki):
        # Clamp to the last causally-needed KV block: skipped tiles repeat the
        # previous block index, so no DMA is issued for them.
        last = (qi * tq + tq - 1) // tk
        return (b, jnp.minimum(ki, last), 0)

    return pl.pallas_call(
        kernel,
        out_shape=jax.ShapeDtypeStruct((B, S, D), out_dtype),
        grid_spec=pltpu.PrefetchScalarGridSpec(
            num_scalar_prefetch=0,
            grid=(B, n_q, S // tk),
            in_specs=[
                pl.BlockSpec((1, tq, D), lambda b, qi, ki: (b, qi, 0)),  # q tile
                pl.BlockSpec((1, tk, D), kv_map),                         # k tile (clamped)
                pl.BlockSpec((1, tk, D), kv_map),                         # v tile (clamped)
                pl.BlockSpec((D, D), lambda b, qi, ki: (0, 0)),           # Wo (const)
                pl.BlockSpec((1, D), lambda b, qi, ki: (0, 0)),           # bo (const)
            ],
            out_specs=pl.BlockSpec((1, tq, D), lambda b, qi, ki: (b, qi, 0)),
            scratch_shapes=[
                pltpu.VMEM((n_heads, tq, 1), jnp.float32),          # running max
                pltpu.VMEM((n_heads, tq, 1), jnp.float32),          # running sum
                pltpu.VMEM((n_heads, tq, head_dim), jnp.float32),   # running acc
                pltpu.VMEM((tq, D), wo.dtype),                      # fused (TQ, D) context
            ],
        ),
        compiler_params=pltpu.CompilerParams(
            dimension_semantics=("parallel", "parallel", "arbitrary"),
            vmem_limit_bytes=_attn_vmem_limit(tq, tk, D, n_heads, head_dim,
                                              itemsize, out_itemsize)),
        cost_estimate=pl.CostEstimate(
            flops=flops, transcendentals=transcendentals,
            bytes_accessed=bytes_accessed),
    )(q, k, v, wo, bo)


# --------------------------------------------------------------------------
# Parameter prep + public wrapper (matches PyTorch MultiHeadAttention.forward)
# --------------------------------------------------------------------------
def prepare_params(params, n_heads, *, compute_dtype=jnp.bfloat16):
    """One-time host-side prep: fuse QKV weights, fold 1/sqrt(head_dim) into
    Wq/bq, cast MXU operands to the compute dtype (biases stay f32)."""
    d_model = params['wq'].shape[0]
    head_dim = d_model // n_heads
    assert head_dim * n_heads == d_model
    scale = 1.0 / math.sqrt(head_dim)
    w_dtype = compute_dtype if compute_dtype is not None else params['wq'].dtype
    w_qkv = jnp.concatenate(
        [params['wq'] * scale, params['wk'], params['wv']], axis=1).astype(w_dtype)
    b_qkv = jnp.concatenate(
        [params['bq'] * scale, params['bk'], params['bv']], axis=1).astype(jnp.float32)
    return {
        'w_qkv': w_qkv, 'b_qkv': b_qkv,
        'wo': params['wo'].astype(w_dtype), 'bo': params['bo'].astype(jnp.float32),
        'n_heads': n_heads, 'head_dim': head_dim, 'compute_dtype': compute_dtype,
    }


def multi_head_attention(x, params, n_heads, *, compute_dtype=jnp.bfloat16,
                         q_tile=None, kv_tile=None, row_tile=None):
    """x: (B, S, D). params: raw dict of (D,D) weights / (1,D) biases, or the
    output of prepare_params (preferred — hoists concat/scale/cast out of the
    per-step path). Default compute dtype is bf16 (f32 accumulation)."""
    out_dtype = x.dtype
    if 'w_qkv' not in params:
        params = prepare_params(params, n_heads, compute_dtype=compute_dtype)
    assert params['n_heads'] == n_heads
    cd = params['compute_dtype']
    xc = x.astype(cd) if cd is not None else x
    q, k, v = _qkv_projection(xc, params['w_qkv'], params['b_qkv'], row_tile=row_tile)
    return _flash_causal_attention(
        q, k, v, params['wo'], params['bo'],
        n_heads=n_heads, head_dim=params['head_dim'],
        q_tile=q_tile, kv_tile=kv_tile, out_dtype=out_dtype)


# --------------------------------------------------------------------------
# Init + pure-JAX reference + self-test
# --------------------------------------------------------------------------
def init_params(key, d_model):
    """Deterministic Linear-style init: U(-1/sqrt(d), 1/sqrt(d))."""
    bound = 1.0 / math.sqrt(d_model)
    keys = jax.random.split(key, 8)
    mk_w = lambda k: jax.random.uniform(k, (d_model, d_model), jnp.float32, -bound, bound)
    mk_b = lambda k: jax.random.uniform(k, (1, d_model), jnp.float32, -bound, bound)
    return {
        'wq': mk_w(keys[0]), 'bq': mk_b(keys[1]),
        'wk': mk_w(keys[2]), 'bk': mk_b(keys[3]),
        'wv': mk_w(keys[4]), 'bv': mk_b(keys[5]),
        'wo': mk_w(keys[6]), 'bo': mk_b(keys[7]),
    }


def reference_mha(x, params, n_heads):
    """Pure-JAX reference of the PyTorch forward (eval mode)."""
    B, S, D = x.shape
    hd = D // n_heads
    q = (x @ params['wq'] + params['bq'][0]).reshape(B, S, n_heads, hd).transpose(0, 2, 1, 3)
    k = (x @ params['wk'] + params['bk'][0]).reshape(B, S, n_heads, hd).transpose(0, 2, 1, 3)
    v = (x @ params['wv'] + params['bv'][0]).reshape(B, S, n_heads, hd).transpose(0, 2, 1, 3)
    scores = jnp.einsum('bhqd,bhkd->bhqk', q, k) / math.sqrt(hd)
    mask = jnp.triu(jnp.ones((S, S), bool), k=1)
    scores = jnp.where(mask, -jnp.inf, scores)
    attn = jax.nn.softmax(scores, axis=-1)
    ctx = jnp.einsum('bhqk,bhkd->bhqd', attn, v).transpose(0, 2, 1, 3).reshape(B, S, D)
    return ctx @ params['wo'] + params['bo'][0]


def _run_and_check(x, params, raw_params, n_heads, tol, **kw):
    out = multi_head_attention(x, params, n_heads, **kw)
    out = jax.block_until_ready(out)
    ref = reference_mha(x, raw_params, n_heads)
    assert out.shape == x.shape
    err = float(jnp.max(jnp.abs(out - ref)))
    assert jnp.allclose(out, ref, atol=tol, rtol=tol), f"max abs err {err}"


if __name__ == "__main__":
    key = jax.random.PRNGKey(0)
    k1, k2, k3, k4 = jax.random.split(key, 4)

    # Small config (module-scale shapes): single tile per axis.
    B, S, D, H = 2, 8, 32, 4
    x = jax.random.normal(k1, (B, S, D), jnp.float32)
    params = init_params(k2, D)
    _run_and_check(x, params, params, H, tol=2e-3, compute_dtype=None)  # exact f32 path
    _run_and_check(x, params, params, H, tol=5e-2)                      # default bf16 path

    # Larger config exercising the multi-tile flash path: online softmax across
    # KV tiles, clamped (no-DMA) causally-skipped tiles, masked/unmasked split.
    B2, S2, D2, H2 = 2, 256, 128, 4
    x2 = jax.random.normal(k3, (B2, S2, D2), jnp.float32)
    params2 = init_params(k4, D2)
    _run_and_check(x2, params2, params2, H2, tol=2e-3, compute_dtype=None,
                   q_tile=128, kv_tile=128)                             # exact f32 path
    prepped = prepare_params(params2, H2)          # hoisted one-time bf16 prep
    _run_and_check(x2, prepped, params2, H2, tol=5e-2, q_tile=128, kv_tile=128)
    _run_and_check(x2, prepped, params2, H2, tol=5e-2)                  # auto tiles

    print("KERNEL_OK")
</pallas_src>

<mosaic_0001>
module attributes {stable_mosaic.version = 11 : i64} {
  func.func @_qkv_proj_kernel(%arg0: i32, %arg1: i32, %arg2: memref<1x8x32xf32, #tpu.memory_space<vmem>>, %arg3: memref<32x96xf32, #tpu.memory_space<vmem>>, %arg4: memref<1x96xf32, #tpu.memory_space<vmem>>, %arg5: memref<1x8x32xf32, #tpu.memory_space<vmem>>, %arg6: memref<1x8x32xf32, #tpu.memory_space<vmem>>, %arg7: memref<1x8x32xf32, #tpu.memory_space<vmem>>) attributes {dimension_semantics = [#tpu.dimension_semantics<parallel>, #tpu.dimension_semantics<parallel>], iteration_bounds = array<i64: 2, 1>, scalar_prefetch = 0 : i64, scratch_operands = 0 : i64, tpu.core_type = #tpu.core_type<tc>, window_params = [{transform_indices = @transform_0, window_bounds = array<i64: 1, 8, 32>}, {pipeline_mode = #tpu.pipeline_mode<synchronous>, transform_indices = @transform_1, window_bounds = array<i64: 32, 96>}, {pipeline_mode = #tpu.pipeline_mode<synchronous>, transform_indices = @transform_2, window_bounds = array<i64: 1, 96>}, {transform_indices = @transform_3, window_bounds = array<i64: 1, 8, 32>}, {transform_indices = @transform_4, window_bounds = array<i64: 1, 8, 32>}, {transform_indices = @transform_5, window_bounds = array<i64: 1, 8, 32>}]} {
    %c0 = arith.constant 0 : index
    %c0_0 = arith.constant 0 : index
    %c0_1 = arith.constant 0 : index
    %0 = vector.load %arg2[%c0, %c0_0, %c0_1] : memref<1x8x32xf32, #tpu.memory_space<vmem>>, vector<1x8x32xf32>
    %1 = vector.shape_cast %0 : vector<1x8x32xf32> to vector<8x32xf32>
    %c0_2 = arith.constant 0 : index
    %c0_3 = arith.constant 0 : index
    %2 = vector.load %arg3[%c0_2, %c0_3] : memref<32x96xf32, #tpu.memory_space<vmem>>, vector<32x96xf32>
    %cst = arith.constant dense<0.000000e+00> : vector<8x96xf32>
    %3 = tpu.matmul %1, %2, %cst {dimension_numbers = #tpu.dot_dimension_numbers<[1], [0], [0], [1], [0, 0, 1, 1], [], []>} : vector<8x32xf32>, vector<32x96xf32>, vector<8x96xf32> -> vector<8x96xf32>
    %c0_4 = arith.constant 0 : index
    %c0_5 = arith.constant 0 : index
    %4 = vector.load %arg4[%c0_4, %c0_5] : memref<1x96xf32, #tpu.memory_space<vmem>>, vector<1x96xf32>
    %5 = vector.shape_cast %4 : vector<1x96xf32> to vector<96xf32>
    %6 = vector.shape_cast %5 : vector<96xf32> to vector<1x96xf32>
    %7 = vector.broadcast %6 : vector<1x96xf32> to vector<8x96xf32>
    %8 = arith.addf %3, %7 : vector<8x96xf32>
    %9 = vector.extract_strided_slice %8 {offsets = [0, 0], sizes = [8, 32], strides = [1, 1]} : vector<8x96xf32> to vector<8x32xf32>
    %c0_6 = arith.constant 0 : index
    %c0_7 = arith.constant 0 : index
    %c0_8 = arith.constant 0 : index
    %10 = vector.load %arg5[%c0_6, %c0_7, %c0_8] : memref<1x8x32xf32, #tpu.memory_space<vmem>>, vector<1x8x32xf32>
    %11 = vector.shape_cast %10 : vector<1x8x32xf32> to vector<8x32xf32>
    %12 = vector.shape_cast %9 : vector<8x32xf32> to vector<1x8x32xf32>
    tpu.vector_store %arg5[%c0_6, %c0_7, %c0_8], %12 {strides = array<i32>} : memref<1x8x32xf32, #tpu.memory_space<vmem>>, vector<1x8x32xf32>,
    %13 = vector.extract_strided_slice %8 {offsets = [0, 32], sizes = [8, 32], strides = [1, 1]} : vector<8x96xf32> to vector<8x32xf32>
    %c0_9 = arith.constant 0 : index
    %c0_10 = arith.constant 0 : index
    %c0_11 = arith.constant 0 : index
    %14 = vector.load %arg6[%c0_9, %c0_10, %c0_11] : memref<1x8x32xf32, #tpu.memory_space<vmem>>, vector<1x8x32xf32>
    %15 = vector.shape_cast %14 : vector<1x8x32xf32> to vector<8x32xf32>
    %16 = vector.shape_cast %13 : vector<8x32xf32> to vector<1x8x32xf32>
    tpu.vector_store %arg6[%c0_9, %c0_10, %c0_11], %16 {strides = array<i32>} : memref<1x8x32xf32, #tpu.memory_space<vmem>>, vector<1x8x32xf32>,
    %17 = vector.extract_strided_slice %8 {offsets = [0, 64], sizes = [8, 32], strides = [1, 1]} : vector<8x96xf32> to vector<8x32xf32>
    %c0_12 = arith.constant 0 : index
    %c0_13 = arith.constant 0 : index
    %c0_14 = arith.constant 0 : index
    %18 = vector.load %arg7[%c0_12, %c0_13, %c0_14] : memref<1x8x32xf32, #tpu.memory_space<vmem>>, vector<1x8x32xf32>
    %19 = vector.shape_cast %18 : vector<1x8x32xf32> to vector<8x32xf32>
    %20 = vector.shape_cast %17 : vector<8x32xf32> to vector<1x8x32xf32>
    tpu.vector_store %arg7[%c0_12, %c0_13, %c0_14], %20 {strides = array<i32>} : memref<1x8x32xf32, #tpu.memory_space<vmem>>, vector<1x8x32xf32>,
    return
  }
  func.func @transform_0(%arg0: i32, %arg1: i32) -> (i32, i32, i32) {
    %c0_i32 = arith.constant 0 : i32
    %c0_i32_0 = arith.constant 0 : i32
    return %arg0, %arg1, %c0_i32 : i32, i32, i32
  }
  func.func @transform_1(%arg0: i32, %arg1: i32) -> (i32, i32) {
    %c0_i32 = arith.constant 0 : i32
    %c0_i32_0 = arith.constant 0 : i32
    %c0_i32_1 = arith.constant 0 : i32
    return %c0_i32, %c0_i32_0 : i32, i32
  }
  func.func @transform_2(%arg0: i32, %arg1: i32) -> (i32, i32) {
    %c0_i32 = arith.constant 0 : i32
    %c0_i32_0 = arith.constant 0 : i32
    %c0_i32_1 = arith.constant 0 : i32
    return %c0_i32, %c0_i32_0 : i32, i32
  }
  func.func @transform_3(%arg0: i32, %arg1: i32) -> (i32, i32, i32) {
    %c0_i32 = arith.constant 0 : i32
    %c0_i32_0 = arith.constant 0 : i32
    return %arg0, %arg1, %c0_i32 : i32, i32, i32
  }
  func.func @transform_4(%arg0: i32, %arg1: i32) -> (i32, i32, i32) {
    %c0_i32 = arith.constant 0 : i32
    %c0_i32_0 = arith.constant 0 : i32
    return %arg0, %arg1, %c0_i32 : i32, i32, i32
  }
  func.func @transform_5(%arg0: i32, %arg1: i32) -> (i32, i32, i32) {
    %c0_i32 = arith.constant 0 : i32
    %c0_i32_0 = arith.constant 0 : i32
    return %arg0, %arg1, %c0_i32 : i32, i32, i32
  }
}

</mosaic_0001>

<bundles_post_ra>
// kernel: tpu_custom_call.1
= control target key start
LH: loop header
LB: loop body
LE: loop exit
PB: predicated region body
PF: predicated region fallthrough
CT: control target
= control target key end

     0   :  { %11 = vsyncpa [#allocation3], 0  ;;  %s1279_s0 = inlined_call_operand.hbm [shape: f32[2,8,32], index: 0, kind: input, shape index: {}]   ;;  %s1280_s1 = inlined_call_operand.hbm [shape: f32[32,96], index: 1, kind: input, shape index: {}]   ;;  %s1281_s2 = inlined_call_operand.vmem [shape: f32[1,96], index: 2, kind: input, shape index: {}]   ;;  %s1282_s3 = inlined_call_operand.hbm [shape: f32[2,8,32], index: 3, kind: output, shape index: {0}]   ;;  %s1283_s4 = inlined_call_operand.hbm [shape: f32[2,8,32], index: 4, kind: output, shape index: {1}]   ;;  %s1284_s5 = inlined_call_operand.hbm [shape: f32[2,8,32], index: 5, kind: output, shape index: {2}]  }
   0x1   :  { %13 = vsyncpa [#allocation3 + $0x1], 0 }
   0x2   :  { %14 = vsyncpa [#allocation6], 0 }
   0x3   :  { %15 = vsyncpa [#allocation4], 0 }
   0x4   :  { %17 = vsyncpa [#allocation4 + $0x1], 0 }
   0x5   :  { %18 = vsyncpa [#allocation9], 0 }
   0x6   :  { %20 = vsyncpa [#allocation9 + $0x1], 0  ;;  %s979_s18 = smov 0   ;;  %s981_s19 = smov 0  }
   0x7   :  { %s983_s20 = smov 0   ;;  %s985_s21 = smov 0  }
   0x8   :  { %s987_s22 = smov 0   ;;  %s989_s23 = smov 0  }
   0x9 LB: > { %s1010_s24 = sadd.s32 4294967295, %s935_s23   ;;  %s1288_s25 = sadd.s32 4294967294, %s935_s23   ;;  %s935_s23 = sphi %s989_s23, %s26_s23   ;;  %s931_s22 = sphi %s987_s22, %s1308_s22   ;;  %s927_s21 = sphi %s985_s21, %s1307_s21   ;;  %s923_s20 = sphi %s983_s20, %s1306_s20   ;;  %s919_s19 = sphi %s981_s19, %s1305_s19   ;;  %s915_s18 = sphi %s979_s18, %s1304_s18  }
   0xa   : > { %p60_p0 = scmp.ne.s32.totalorder %s919_s19, %s915_s18  ;;  %p1285_p1 = scmp.eq.s32.totalorder %s1010_s24, 0 }
   0xb   : > { %p134_p3 = scmp.eq.s32.totalorder %s1288_s25, 1  ;;  %p598_p5 = scmp.ge.s32.totalorder %s935_s23, 1 }
   0xc   : > { %p1021_p4 = por %p1285_p1, %p60_p0  ;;  %p197_p7 = scmp.lt.s32.totalorder %s935_s23, 3 }
   0xd   : > { %p1026_p6 = por %p134_p3, %p60_p0  ;;  %s937_s29 = smov [#allocation5]  }
   0xe   : > { %s1289_s26 = scalar_select %p1021_p4, 1, 0 }
   0xf   : > { %s1290_s27 = scalar_select %p1026_p6, 1, 0 }
  0x10   : > { %p1031_p8 = pnand %p598_p5, %p197_p7  ;;  %s209_s30 = sshll.u32 %s937_s29, 4  ;;  %s210_s30 = int_to_ptr.vmem [resolvable:$true] %s209_s30 }
  0x11   : > { %s38_s7 = sadd.s32 1, %s931_s22  ;;  %s731_s10 = scalar_lea.hbm %s1280_s1, 512 }
  0x12   : > { %s1291_s28 = scalar_select %p1031_p8, 1, 0 }
  0x13   : > { %p653_p9 = pneg %p1031_p8  ;;  %p732_p12 = scmp.ne.s32.totalorder %s1280_s1, %s731_s10 }
  0x14   : > { %p738_p5 = scmp.lt.u32.totalorder %s731_s10, %s1280_s1 }
  0x15   : > { %p1040_p11 = pnand %p653_p9, %p1285_p1 }
  0x17   : > { %p733_p13 = pneg %p1040_p11 }
  0x19   : > { %p734_p0 = pnand %p733_p13, %p732_p12 }
  0x1b   : > { %p735_p3 = pneg %p734_p0 }
  0x1d   : > { %p740_p7 = pnand %p738_p5, %p735_p3 }
  0x1f   : > { %743 = shalt.err (!%p740_p7)
}
  0x20   : > { %s744_s15 = scalar_lea.vmem %s210_s30, 512  ;;  %p752_p2 = scmp.lt.s32.totalorder %s210_s30, %s210_s30 }
  0x21   : > { %p745_p9 = scmp.ne.s32.totalorder %s210_s30, %s744_s15  ;;  %p753_p6 = scmp.lt.s32.totalorder %s744_s15, %s744_s15 }
  0x23   : > { %p747_p10 = pnand %p745_p9, %p733_p13  ;;  %p754_p4 = por %p753_p6, %p752_p2 }
  0x25   : > { %p748_p1 = pneg %p747_p10 }
  0x27   : > { %p755_p8 = pnand %p754_p4, %p748_p1 }
  0x29   : > { %758 = shalt.err (!%p755_p8)
}
  0x2a   : > { %s938_s16 = smov 128   ;;  %s939_s17 = smov 8  }
  0x2b   : > { %656 = dma.hbm_to_vmem [thread:$0]  (!%p1040_p11), %s1280_s1, 512, %s210_s30, [#allocation6], %s938_s16, %s938_s16, %s939_s17  }
  0x2c   : > { %p40_p1 = scmp.ge.s32.totalorder %s38_s7, 2  ;;  %s47_s9 = sadd.s32 1, %s923_s20 }
  0x2d   : > { %p54_p2 = scmp.ne.s32.totalorder %s923_s20, %s919_s19  ;;  %p55_p4 = scmp.eq.s32.totalorder %s935_s23, 0 }
  0x2e   : > { %s1310_s7 = smov (%p40_p1, %s38_s7), 0  ;;  %p1294_p8 = scmp.eq.s32.totalorder %s1010_s24, 1 }
  0x2f   : > { %p1067_p6 = por %p55_p4, %p54_p2  ;;  %s42_s6 = ssub.s32 %s931_s22, %s1310_s7 }
  0x30   : > { %p1073_p10 = por %p1294_p8, %p54_p2  ;;  %p672_p12 = scmp.lt.s32.totalorder %s935_s23, 2 }
  0x31   : > { %p45_p11 = scmp.eq.s32.totalorder %s42_s6, 0  ;;  %s226_s30 = sand.u32 1, %s923_s20  }
  0x32   : > { %s601_s12 = sshll.u32 %s226_s30, 3  ;;  %s602_s14 = sshll.u32 %s931_s22, 7 }
  0x33   : > { %s1082_s13 = scalar_select %p45_p11, %s923_s20, %s47_s9  }
  0x34   : > { %s1088_s17 = scalar_lea.hbm %s1279_s0, %s602_s14  ;;  %s230_s29 = scalar_lea.vmem [#allocation2], %s601_s12 }
  0x35   : > { %s238_s8 = sshll.u32 %s230_s29, 4  ;;  %p1094_p13 = pnand %p672_p12, %p1067_p6  ;;  %s1090_s8 = int_to_ptr.vmem [resolvable:$true] %s238_s8 }
  0x36   : > { %s227_s9 = scalar_lea.sflag [#allocation3], %s226_s30  ;;  %s759_s25 = scalar_lea.hbm %s1088_s17, 128 }
  0x37   : > { %p760_p0 = scmp.ne.s32.totalorder %s1088_s17, %s759_s25  ;;  %p761_p3 = pneg %p1094_p13 }
  0x38   : > { %s764_s15 = scalar_lea.hbm %s1279_s0, 256  ;;  %p765_p9 = scmp.lt.u32.totalorder %s1088_s17, %s1279_s0 }
  0x39   : > { %p762_p5 = pnand %p761_p3, %p760_p0  ;;  %p766_p1 = scmp.lt.u32.totalorder %s764_s15, %s759_s25 }
  0x3a   : > { %p768_p4 = scmp.lt.u32.totalorder %s759_s25, %s1088_s17 }
  0x3b   : > { %p763_p7 = pneg %p762_p5  ;;  %p767_p2 = por %p766_p1, %p765_p9 }
  0x3d   : > { %p769_p6 = por %p768_p4, %p767_p2 }
  0x3f   : > { %p770_p8 = pnand %p769_p6, %p763_p7 }
  0x41   : > { %773 = shalt.err (!%p770_p8)
}
  0x42   : > { %s774_s30 = scalar_lea.vmem %s1090_s8, 128  ;;  %s940_s29 = smov [#allocation2]  }
  0x43   : > { %p775_p12 = scmp.ne.s32.totalorder %s1090_s8, %s774_s30  ;;  %s779_s12 = sshll.u32 %s940_s29, 4  ;;  %s780_s12 = int_to_ptr.vmem [resolvable:$false] %s779_s12 }
  0x44   : > { %s781_s14 = scalar_lea.vmem %s780_s12, 256  ;;  %p782_p5 = scmp.lt.s32.totalorder %s1090_s8, %s780_s12 }
  0x45   : > { %p777_p11 = pnand %p775_p12, %p761_p3  ;;  %p783_p9 = scmp.lt.s32.totalorder %s781_s14, %s774_s30 }
  0x47   : > { %p778_p0 = pneg %p777_p11  ;;  %p784_p1 = por %p783_p9, %p782_p5 }
  0x49   : > { %p785_p2 = pnand %p784_p1, %p778_p0 }
  0x4b   : > { %788 = shalt.err (!%p785_p2)
}
  0x4c   : > { %660 = dma.hbm_to_vmem [thread:$0]  (!%p1094_p13), %s1088_s17, 128, %s1090_s8, %s227_s9  }
  0x4d   : > { %p1297_p7 = scmp.ne.s32.totalorder %s1291_s28, 0 }
  0x4e   : > { %s1126_s25 = sand.u32 (!%p1297_p7), 1, %s919_s19   ;;  %p1298_p3 = scmp.ne.s32.totalorder (!%p1297_p7), %s1289_s26, 0 }
  0x4f   : > { %247 = sbr.rel (%p1297_p7) target bundleno = 466 (0x1d2), region = 32  ;;  %s1129_s15 = sshll.u32 (!%p1297_p7), %s1126_s25, 3 }
  0x50   : > { %s250_s10 = scalar_lea.sflag (!%p1297_p7), [#allocation3], %s1126_s25  ;;  %s253_s16 = scalar_lea.vmem (!%p1297_p7), [#allocation2], %s1129_s15 }
  0x56   : > { %898 = dma.done.wait (%p1298_p3), %s250_s10, 128  }
  0x57   : > { %900 = vsyncadd (%p1298_p3), %s250_s10, 4294967168  ;;  %p1299_p13 = scmp.eq.s32.totalorder %s1010_s24, 0 }
  0x59   : > { %902 = dma.done.wait (%p1299_p13), [#allocation6], 512   ;;  %p1300_p4 = pmov %p1299_p13 }
  0x5a   : > { %v941_v0 = vmov 0.0|0.0   ;;  %vm942_vm0 = vmmov 0   ;;  %v943_v1 = vmov 0.0   ;;  %v295_v2 = vld [vmem:[#allocation5] sm:$0xff]  ;;  %v296_v3 = vld [vmem:[#allocation5 + $0x8] sm:$0xff]  ;;  %v297_v4 = vld [vmem:[#allocation5 + $0x10] sm:$0xff] }
  0x5b   : > { %904 = vsyncadd (%p1300_p4), [#allocation6], 4294966784  ;;  %635 = vmatprep.subr.bf16.mxu0 %v941_v0  ;;  %632 = vmatprep.mubr.msk.f32.mxu0 %vm942_vm0, %v943_v1  ;;  %v636_v5 = vpack.c.bf16 %v296_v3, %v295_v2  ;;  %v298_v6 = vld [vmem:[#allocation5 + $0x18] sm:$0xff]  ;;  %vm306_vm1 = vcmask 261120   ;;  %v609_v9 = vld [vmem:[%s1281_s2] ss:$0 sm:$0xff] }
  0x5c   : > { %v639_v7 = vpack.c.bf16 %v298_v6, %v297_v4  ;;  %v294_v8 = vld [vmem:[%s253_s16] sm:$0xff]  ;;  %s1146_s17 = sshll.u32 %s927_s21, 7  ;;  %s279_s8 = scalar_lea.vmem [#allocation7], %s1129_s15 }
  0x5d   : > { %637 = vmatpush3.bf16.msra.mxu0 %v636_v5  ;;  %s415_s6 = sshll.u32 %s279_s8, 4  ;;  %s1153_s29 = scalar_lea.hbm %s1282_s3, %s1146_s17  ;;  %s1155_s6 = int_to_ptr.vmem [resolvable:$true] %s415_s6 }
  0x5e   : > { %638 = vmatprep.subr.bf16.mxu0 %v941_v0  ;;  %s944_s12 = smov 96   ;;  %s391_s21 = scalar_lea.sflag [#allocation4], %s1126_s25 }
  0x5f   : > { %s789_s14 = scalar_lea.vmem %s1155_s6, 128  ;;  %s945_s10 = smov [#allocation7]  }
  0x60   : > { %p790_p6 = scmp.ne.s32.totalorder %s1155_s6, %s789_s14  ;;  %s793_s16 = sshll.u32 %s945_s10, 4  ;;  %s794_s16 = int_to_ptr.vmem [resolvable:$false] %s793_s16 }
  0x61   : > { %640 = vmatpush3.bf16.msra.mxu0 %v639_v7  ;;  %s795_s26 = scalar_lea.vmem %s794_s16, 256  ;;  %p796_p11 = scmp.lt.s32.totalorder %s1155_s6, %s794_s16 }
  0x62   : > { %p791_p8 = pnand %p790_p6, %p1073_p10  ;;  %p797_p0 = scmp.lt.s32.totalorder %s795_s26, %s789_s14 }
  0x64   : > { %633 = vmatmul.mubr.msk.f32.vlgmr.msra.gmra.mrb[0].mxu0 %vm306_vm1, %v294_v8  ;;  %p792_p12 = pneg %p791_p8  ;;  %p798_p5 = por %p797_p0, %p796_p11 }
  0x66   : > { %p799_p9 = pnand %p798_p5, %p792_p12 }
 0x137   : > { %v376_v10 = vpop.f32.mrb[0].mxu0 }
 0x138   : > { %v377_v11 = vadd.f32 %v609_v9, %v376_v10  ;;  %v634_v12 = vpop.f32.mrb[1].mxu0 }
 0x13a   : > { %382 = vrot.lane.b32.xlu0 %v377_v11, %s944_s12  ;;  %380 = vst.msk [vmem:[%s279_s8] sm:$0xff] %vm306_vm1, %v377_v11 }
 0x13b   : > { %802 = shalt.err (!%p799_p9)
}
 0x13c   : > { %s803_s25 = scalar_lea.hbm %s1153_s29, 128  ;;  %s807_s9 = scalar_lea.hbm %s1282_s3, 256 }
 0x13d   : > { %p804_p1 = scmp.ne.s32.totalorder %s1153_s29, %s803_s25  ;;  %p808_p3 = scmp.lt.u32.totalorder %s1153_s29, %s1282_s3 }
 0x13e   : > { %p809_p13 = scmp.lt.u32.totalorder %s807_s9, %s803_s25  ;;  %p811_p6 = scmp.lt.u32.totalorder %s803_s25, %s1153_s29 }
 0x13f   : > { %p805_p2 = pnand %p804_p1, %p1073_p10 }
 0x140   : > { %p810_p4 = por %p809_p13, %p808_p3 }
 0x141   : > { %p806_p7 = pneg %p805_p2 }
 0x142   : > { %p812_p8 = por %p811_p6, %p810_p4 }
 0x144   : > { %p813_p12 = pnand %p812_p8, %p806_p7 }
 0x146   : > { %816 = shalt.err (!%p813_p12)
}
 0x147   : > { %647 = dma.vmem_to_hbm [thread:$0]  (%p1073_p10), %s1155_s6, 128, %s1153_s29, %s391_s21  }
 0x148   : > { %s946_s14 = smov 64   ;;  %s395_s10 = sand.u32 1, %s1010_s24  }
 0x149   : > { %386 = vrot.lane.b32.xlu0 %v377_v11, %s946_s14  ;;  %s286_s16 = scalar_lea.vmem [#allocation8], %s1129_s15  ;;  %s1186_s8 = scalar_lea.hbm %s1283_s4, %s1146_s17 }
 0x14a   : > { %s429_s26 = sshll.u32 %s286_s16, 4  ;;  %s293_s9 = scalar_lea.vmem [#allocation10], %s1129_s15  ;;  %s1188_s26 = int_to_ptr.vmem [resolvable:$true] %s429_s26 }
 0x14b   : > { %s1193_s30 = sshll.u32 %s293_s9, 4  ;;  %s1196_s24 = scalar_lea.sflag [#allocation9], %s395_s10  ;;  %s1227_s30 = int_to_ptr.vmem [resolvable:$true] %s1193_s30 }
 0x14c   : > { %s817_s6 = scalar_lea.vmem %s1188_s26, 128  ;;  %s947_s29 = smov [#allocation8]  }
 0x14d   : > { %p818_p11 = scmp.ne.s32.totalorder %s1188_s26, %s817_s6  ;;  %s821_s21 = sshll.u32 %s947_s29, 4  ;;  %s822_s21 = int_to_ptr.vmem [resolvable:$false] %s821_s21 }
 0x14e   : > { %s823_s12 = scalar_lea.vmem %s822_s21, 256  ;;  %p824_p9 = scmp.lt.s32.totalorder %s1188_s26, %s822_s21 }
 0x14f   : > { %p819_p0 = pnand %p818_p11, %p1073_p10  ;;  %p825_p1 = scmp.lt.s32.totalorder %s823_s12, %s817_s6 }
 0x151   : > { %p820_p5 = pneg %p819_p0  ;;  %p826_p2 = por %p825_p1, %p824_p9 }
 0x153   : > { %p827_p7 = pnand %p826_p2, %p820_p5 }
 0x1ac   : > { %v383_v13 = vpop.permute.xlu0 %382 }
 0x1ad   : > { %385 = vst.msk [vmem:[%s286_s16] sm:$0xff] %vm306_vm1, %v383_v13 }
 0x1ae   : > { %830 = shalt.err (!%p827_p7)
}
 0x1af   : > { %s831_s14 = scalar_lea.hbm %s1186_s8, 128  ;;  %s835_s25 = scalar_lea.hbm %s1283_s4, 256 }
 0x1b0   : > { %p832_p3 = scmp.ne.s32.totalorder %s1186_s8, %s831_s14  ;;  %p836_p6 = scmp.lt.u32.totalorder %s1186_s8, %s1283_s4 }
 0x1b1   : > { %p837_p8 = scmp.lt.u32.totalorder %s835_s25, %s831_s14  ;;  %p839_p11 = scmp.lt.u32.totalorder %s831_s14, %s1186_s8 }
 0x1b2   : > { %p833_p13 = pnand %p832_p3, %p1073_p10 }
 0x1b3   : > { %p838_p12 = por %p837_p8, %p836_p6 }
 0x1b4   : > { %p834_p4 = pneg %p833_p13 }
 0x1b5   : > { %p840_p0 = por %p839_p11, %p838_p12 }
 0x1b7   : > { %p841_p5 = pnand %p840_p0, %p834_p4 }
 0x1b9   : > { %844 = shalt.err (!%p841_p5)
}
 0x1ba   : > { %648 = dma.vmem_to_hbm [thread:$0]  (%p1073_p10), %s1188_s26, 128, %s1186_s8, %s1196_s24  }
 0x1bb   : > { %s1224_s12 = scalar_lea.hbm %s1284_s5, %s1146_s17  ;;  %v387_v14 = vpop.permute.xlu0 %386  ;;  %s845_s14 = scalar_lea.vmem %s1227_s30, 128 }
 0x1bc   : > { %389 = vst.msk [vmem:[%s293_s9] sm:$0xff] %vm306_vm1, %v387_v14  ;;  %p846_p9 = scmp.ne.s32.totalorder %s1227_s30, %s845_s14  ;;  %s948_s26 = smov [#allocation10]  }
 0x1bd   : > { %s849_s8 = sshll.u32 %s948_s26, 4  ;;  %s850_s8 = int_to_ptr.vmem [resolvable:$false] %s849_s8 }
 0x1be   : > { %p847_p1 = pnand %p846_p9, %p1073_p10  ;;  %s851_s10 = scalar_lea.vmem %s850_s8, 256 }
 0x1bf   : > { %p852_p7 = scmp.lt.s32.totalorder %s1227_s30, %s850_s8  ;;  %p853_p3 = scmp.lt.s32.totalorder %s851_s10, %s845_s14 }
 0x1c0   : > { %p848_p2 = pneg %p847_p1 }
 0x1c1   : > { %p854_p13 = por %p853_p3, %p852_p7 }
 0x1c3   : > { %p855_p4 = pnand %p854_p13, %p848_p2 }
 0x1c5   : > { %858 = shalt.err (!%p855_p4)
}
 0x1c6   : > { %s859_s15 = scalar_lea.hbm %s1224_s12, 128  ;;  %s863_s16 = scalar_lea.hbm %s1284_s5, 256 }
 0x1c7   : > { %p860_p6 = scmp.ne.s32.totalorder %s1224_s12, %s859_s15  ;;  %p864_p11 = scmp.lt.u32.totalorder %s1224_s12, %s1284_s5 }
 0x1c8   : > { %p865_p0 = scmp.lt.u32.totalorder %s863_s16, %s859_s15  ;;  %p867_p9 = scmp.lt.u32.totalorder %s859_s15, %s1224_s12 }
 0x1c9   : > { %p861_p8 = pnand %p860_p6, %p1073_p10 }
 0x1ca   : > { %p866_p5 = por %p865_p0, %p864_p11 }
 0x1cb   : > { %p862_p12 = pneg %p861_p8 }
 0x1cc   : > { %p868_p1 = por %p867_p9, %p866_p5 }
 0x1ce   : > { %p869_p2 = pnand %p868_p1, %p862_p12 }
 0x1d0   : > { %872 = shalt.err (!%p869_p2)
}
 0x1d1   : > { %649 = dma.vmem_to_hbm [thread:$0]  (%p1073_p10), %s1227_s30, 128, %s1224_s12, %s1196_s24  }
 0x1d2 PF: > { %s455_s29 = sand.u32 1, %s915_s18   ;;  %p1301_p7 = scmp.ne.s32.totalorder %s1290_s27, 0 }
 0x1d3   : > { %p1302_p3 = scmp.ge.s32.totalorder %s935_s23, 2  ;;  %s456_s6 = scalar_lea.sflag [#allocation4], %s455_s29 }
 0x1d5   : > { %p662_p13 = pnand %p1302_p3, %p1301_p7 }
 0x1d7   : > { %906 = dma.done.wait (!%p662_p13), %s456_s6, 128  }
 0x1d8   : > { %908 = vsyncadd (!%p662_p13), %s456_s6, 4294967168  ;;  %s1303_s21 = sadd.s32 4294967294, %s935_s23  }
 0x1d9   : > { %s464_s14 = sand.u32 1, %s1303_s21  }
 0x1da   : > { %s465_s26 = scalar_lea.sflag [#allocation9], %s464_s14 }
 0x1db   : > { %910 = dma.done.wait (!%p662_p13), %s465_s26, 256  }
 0x1dc   : > { %912 = vsyncadd (!%p662_p13), %s465_s26, 4294967040  ;;  %s26_s23 = sadd.s32 1, %s935_s23   ;;  %s1304_s18 = smov %s919_s19 }
 0x1dd   : > { %p23_p10 = scmp.ge.s32.totalorder %s26_s23, 4   ;;  %s1305_s19 = smov %s923_s20 }
 0x1de   : > { %s1306_s20 = smov %s1082_s13  ;;  %s1307_s21 = smov %s931_s22 }
 0x1df   : > { %s1308_s22 = smov %s1310_s7  ;;  %25 = sbr.rel (!%p23_p10) target bundleno = 9 (0x9), region = 113 }
 0x1e6   :  { %479 = vsyncpa [#allocation3], 1 }
 0x1e7   :  { %481 = vsyncpa [#allocation3 + $0x1], 1 }
 0x1e8   :  { %482 = vsyncpa [#allocation6], 1 }
 0x1e9   :  { %483 = vsyncpa [#allocation4], 1 }
 0x1ea   :  { %485 = vsyncpa [#allocation4 + $0x1], 1 }
 0x1eb   :  { %486 = vsyncpa [#allocation9], 1 }
 0x1ec   :  { %488 = vsyncpa [#allocation9 + $0x1], 1 }

</bundles_post_ra>
